<compile_context>
chip_gen: v5e
topology: v5e:2x2
jax: 0.10.0
libtpu: 0.0.40
codegen_flags: <defaults>
</compile_context>

<pallas_src>
import math

import jax
import jax.numpy as jnp
from jax.experimental import pallas as pl
from jax.experimental.pallas import tpu as pltpu


def _round_up(x, m):
    return ((x + m - 1) // m) * m


def _gfe_kernel(t_ref, w_ref, w1s_ref, w1c_ref, b1_ref, w2_ref, b2_ref, o_ref):
    # Feature-major (transposed) layout: batch lives on the lane axis.
    # t_ref:   (1, TB)       time steps, lane-dense
    # w_ref:   (Dh, 1)       frequencies, already scaled by 2*pi
    # w1s_ref: (H, Dh)       first-linear columns matching sin(x_proj)
    # w1c_ref: (H, Dh)       first-linear columns matching cos(x_proj)
    # b1_ref:  (H, 1)
    # w2_ref:  (D, H)        second-linear weight (PyTorch (out, in) as-is)
    # b2_ref:  (D, 1)
    # o_ref:   (D, TB)       transposed output tile
    t = t_ref[...]                                   # (1, TB)
    x_proj = w_ref[...] * t                          # (Dh, TB), lane-dense

    s = jnp.sin(x_proj)
    c = jnp.cos(x_proj)

    # Linear 1 (transposed): h^T = W1[:, :Dh] @ sin^T + W1[:, Dh:] @ cos^T + b1
    h = (jnp.dot(w1s_ref[...], s, preferred_element_type=jnp.float32)
         + jnp.dot(w1c_ref[...], c, preferred_element_type=jnp.float32)
         + b1_ref[...])                              # (H, TB)

    # Mish with a single exp:
    #   tanh(softplus(h)) = ((1+e)^2 - 1) / ((1+e)^2 + 1) = num / (num + 2),
    #   num = e*(e+2), e = exp(h).  For h > 20 the multiplier is ~1 -> mish(h)=h.
    e = jnp.exp(jnp.minimum(h, 20.0))
    num = e * (e + 2.0)
    mish = h * num * pl.reciprocal(num + 2.0, approx=True)
    h = jnp.where(h > 20.0, h, mish)

    # Linear 2 (transposed): out^T = W2 @ h^T + b2
    out = jnp.dot(w2_ref[...], h, preferred_element_type=jnp.float32) + b2_ref[...]
    o_ref[...] = out.astype(o_ref.dtype)             # full-width (lane-dense) store


def gaussian_fourier_embedding(t, W, W1, b1, W2, b2, *, tb=2048):
    """t: (B,) float32. Returns (B, time_embed_dim)."""
    B = t.shape[0]
    Dh = W.shape[0]               # time_embed_dim // 2
    D = 2 * Dh                    # time_embed_dim
    H = W1.shape[0]               # 2 * time_embed_dim (PyTorch weight is (out, in))

    # Batch tile on the lane axis: multiple of 128.  Large default to amortize
    # per-grid-step overhead, but capped so big batches keep >=4 grid steps
    # (lets dimension_semantics=("parallel",) feed both v7x TensorCores).
    TB = _round_up(tb, 128)
    TB = min(TB, max(128, _round_up((B + 3) // 4, 128)))
    B_pad = _round_up(B, TB)
    grid = (B_pad // TB,)

    # --- glue (plain JAX): layout + constant folding -------------------------
    t2 = jnp.pad(t.astype(jnp.float32), (0, B_pad - B)).reshape(1, B_pad)
    w_col = (W.astype(jnp.float32) * (2.0 * math.pi)).reshape(Dh, 1)  # 2*pi folded
    w1f = W1.astype(jnp.float32)                                      # (H, D)
    w1_sin = w1f[:, :Dh]                                              # (H, Dh)
    w1_cos = w1f[:, Dh:]                                              # (H, Dh)
    b1_col = b1.astype(jnp.float32).reshape(H, 1)                     # (H, 1)
    w2f = W2.astype(jnp.float32)                                      # (D, H)
    b2_col = b2.astype(jnp.float32).reshape(D, 1)                     # (D, 1)

    def resident(shape):
        return pl.BlockSpec(shape, lambda i: tuple(0 for _ in shape))

    # VMEM budget for the transposed tiles (double-buffered t/out + resident
    # params + (H,TB)/(Dh,TB) temporaries headroom).
    f32 = 4
    vmem_bytes = int(
        2 * (1 * TB + D * TB) * f32                    # pipelined t / out^T tiles
        + 2 * (Dh + 2 * Dh * H + H + D * H + D) * f32  # resident weights / biases
        + 8 * H * TB * f32                             # intermediates headroom
        + (4 << 20)                                    # slack
    )

    cost = pl.CostEstimate(
        flops=2 * B * (2 * Dh * H + H * D),
        transcendentals=B * (2 * Dh + 2 * H),          # sin, cos, exp, recip
        bytes_accessed=f32 * (B + B * D + Dh + 2 * Dh * H + H + H * D + D),
    )

    out_t = pl.pallas_call(
        _gfe_kernel,
        out_shape=jax.ShapeDtypeStruct((D, B_pad), jnp.float32),
        grid=grid,
        in_specs=[
            pl.BlockSpec((1, TB), lambda i: (0, i)),   # lane-dense t tile
            resident((Dh, 1)),
            resident((H, Dh)),
            resident((H, Dh)),
            resident((H, 1)),
            resident((D, H)),
            resident((D, 1)),
        ],
        out_specs=pl.BlockSpec((D, TB), lambda i: (0, i)),
        compiler_params=pltpu.CompilerParams(
            dimension_semantics=("parallel",),         # v7x: shard tiles across 2 TCs
            vmem_limit_bytes=vmem_bytes,
        ),
        cost_estimate=cost,
    )(t2, w_col, w1_sin, w1_cos, b1_col, w2f, b2_col)

    # Transpose back to (B, D) in the wrapper (plain XLA, negligible at D=32).
    return out_t[:, :B].T


def _reference(t, W, W1, b1, W2, b2):
    x_proj = t[:, None] * W[None, :] * 2.0 * math.pi
    fourier = jnp.concatenate([jnp.sin(x_proj), jnp.cos(x_proj)], axis=-1)
    h = fourier @ W1.T + b1
    h = h * jnp.tanh(jax.nn.softplus(h))
    return h @ W2.T + b2


if __name__ == "__main__":
    time_embed_dim = 32
    scale = 30.0

    key = jax.random.PRNGKey(0)
    k_t, k_w, k_w1, k_b1, k_w2, k_b2, k_t2 = jax.random.split(key, 7)

    # Deterministic parameter init mirroring the PyTorch module's shapes.
    W = jax.random.normal(k_w, (time_embed_dim // 2,), dtype=jnp.float32) * scale
    lim1 = 1.0 / math.sqrt(time_embed_dim)
    W1 = jax.random.uniform(k_w1, (2 * time_embed_dim, time_embed_dim),
                            minval=-lim1, maxval=lim1, dtype=jnp.float32)
    b1 = jax.random.uniform(k_b1, (2 * time_embed_dim,),
                            minval=-lim1, maxval=lim1, dtype=jnp.float32)
    lim2 = 1.0 / math.sqrt(2 * time_embed_dim)
    W2 = jax.random.uniform(k_w2, (time_embed_dim, 2 * time_embed_dim),
                            minval=-lim2, maxval=lim2, dtype=jnp.float32)
    b2 = jax.random.uniform(k_b2, (time_embed_dim,),
                            minval=-lim2, maxval=lim2, dtype=jnp.float32)

    # Tolerance is loosened slightly because mish uses the approx EUP reciprocal.
    TOL = dict(atol=5e-3, rtol=5e-3)

    # Small batch (single grid step, padded to one 128-wide tile).
    t_small = jax.random.uniform(k_t, (8,), dtype=jnp.float32)
    out_small = jax.block_until_ready(
        gaussian_fourier_embedding(t_small, W, W1, b1, W2, b2))
    assert out_small.shape == (8, time_embed_dim)
    assert jnp.allclose(out_small, _reference(t_small, W, W1, b1, W2, b2), **TOL)

    # Larger batch, not a multiple of the tile: exercises the grid + tail padding.
    t_big = jax.random.uniform(k_t2, (1000,), dtype=jnp.float32)
    out_big = jax.block_until_ready(
        gaussian_fourier_embedding(t_big, W, W1, b1, W2, b2))
    assert out_big.shape == (1000, time_embed_dim)
    assert jnp.allclose(out_big, _reference(t_big, W, W1, b1, W2, b2), **TOL)

    print("KERNEL_OK")
</pallas_src>

<mosaic_0001>
module attributes {stable_mosaic.version = 11 : i64} {
  func.func @_gfe_kernel(%arg0: i32, %arg1: memref<1x128xf32, #tpu.memory_space<vmem>>, %arg2: memref<16x1xf32, #tpu.memory_space<vmem>>, %arg3: memref<64x16xf32, #tpu.memory_space<vmem>>, %arg4: memref<64x16xf32, #tpu.memory_space<vmem>>, %arg5: memref<64x1xf32, #tpu.memory_space<vmem>>, %arg6: memref<32x64xf32, #tpu.memory_space<vmem>>, %arg7: memref<32x1xf32, #tpu.memory_space<vmem>>, %arg8: memref<32x128xf32, #tpu.memory_space<vmem>>) attributes {dimension_semantics = [#tpu.dimension_semantics<parallel>], iteration_bounds = array<i64: 1>, scalar_prefetch = 0 : i64, scratch_operands = 0 : i64, tpu.core_type = #tpu.core_type<tc>, window_params = [{transform_indices = @transform_0, window_bounds = array<i64: 1, 128>}, {pipeline_mode = #tpu.pipeline_mode<synchronous>, transform_indices = @transform_1, window_bounds = array<i64: 16, 1>}, {pipeline_mode = #tpu.pipeline_mode<synchronous>, transform_indices = @transform_2, window_bounds = array<i64: 64, 16>}, {pipeline_mode = #tpu.pipeline_mode<synchronous>, transform_indices = @transform_3, window_bounds = array<i64: 64, 16>}, {pipeline_mode = #tpu.pipeline_mode<synchronous>, transform_indices = @transform_4, window_bounds = array<i64: 64, 1>}, {pipeline_mode = #tpu.pipeline_mode<synchronous>, transform_indices = @transform_5, window_bounds = array<i64: 32, 64>}, {pipeline_mode = #tpu.pipeline_mode<synchronous>, transform_indices = @transform_6, window_bounds = array<i64: 32, 1>}, {transform_indices = @transform_7, window_bounds = array<i64: 32, 128>}]} {
    %c0 = arith.constant 0 : index
    %c0_0 = arith.constant 0 : index
    %0 = vector.load %arg1[%c0, %c0_0] : memref<1x128xf32, #tpu.memory_space<vmem>>, vector<1x128xf32>
    %c0_1 = arith.constant 0 : index
    %c0_2 = arith.constant 0 : index
    %1 = vector.load %arg2[%c0_1, %c0_2] : memref<16x1xf32, #tpu.memory_space<vmem>>, vector<16x1xf32>
    %2 = vector.broadcast %1 : vector<16x1xf32> to vector<16x128xf32>
    %3 = vector.broadcast %0 : vector<1x128xf32> to vector<16x128xf32>
    %4 = arith.mulf %2, %3 : vector<16x128xf32>
    %5 = math.sin %4 : vector<16x128xf32>
    %6 = math.cos %4 : vector<16x128xf32>
    %c0_3 = arith.constant 0 : index
    %c0_4 = arith.constant 0 : index
    %7 = vector.load %arg3[%c0_3, %c0_4] : memref<64x16xf32, #tpu.memory_space<vmem>>, vector<64x16xf32>
    %cst = arith.constant dense<0.000000e+00> : vector<64x128xf32>
    %8 = tpu.matmul %7, %5, %cst {dimension_numbers = #tpu.dot_dimension_numbers<[1], [0], [0], [1], [0, 0, 1, 1], [], []>} : vector<64x16xf32>, vector<16x128xf32>, vector<64x128xf32> -> vector<64x128xf32>
    %c0_5 = arith.constant 0 : index
    %c0_6 = arith.constant 0 : index
    %9 = vector.load %arg4[%c0_5, %c0_6] : memref<64x16xf32, #tpu.memory_space<vmem>>, vector<64x16xf32>
    %cst_7 = arith.constant dense<0.000000e+00> : vector<64x128xf32>
    %10 = tpu.matmul %9, %6, %cst_7 {dimension_numbers = #tpu.dot_dimension_numbers<[1], [0], [0], [1], [0, 0, 1, 1], [], []>} : vector<64x16xf32>, vector<16x128xf32>, vector<64x128xf32> -> vector<64x128xf32>
    %11 = arith.addf %8, %10 : vector<64x128xf32>
    %c0_8 = arith.constant 0 : index
    %c0_9 = arith.constant 0 : index
    %12 = vector.load %arg5[%c0_8, %c0_9] : memref<64x1xf32, #tpu.memory_space<vmem>>, vector<64x1xf32>
    %13 = vector.broadcast %12 : vector<64x1xf32> to vector<64x128xf32>
    %14 = arith.addf %11, %13 : vector<64x128xf32>
    %cst_10 = arith.constant 2.000000e+01 : f32
    %15 = vector.broadcast %cst_10 : f32 to vector<64x128xf32>
    %16 = arith.minimumf %14, %15 : vector<64x128xf32>
    %17 = math.exp %16 : vector<64x128xf32>
    %cst_11 = arith.constant 2.000000e+00 : f32
    %18 = vector.broadcast %cst_11 : f32 to vector<64x128xf32>
    %19 = arith.addf %17, %18 : vector<64x128xf32>
    %20 = arith.mulf %17, %19 : vector<64x128xf32>
    %21 = arith.mulf %14, %20 : vector<64x128xf32>
    %cst_12 = arith.constant 2.000000e+00 : f32
    %22 = vector.broadcast %cst_12 : f32 to vector<64x128xf32>
    %23 = arith.addf %20, %22 : vector<64x128xf32>
    %24 = tpu.reciprocal %23 {approx = true} : vector<64x128xf32> -> vector<64x128xf32>
    %25 = arith.mulf %21, %24 : vector<64x128xf32>
    %cst_13 = arith.constant 2.000000e+01 : f32
    %26 = vector.broadcast %cst_13 : f32 to vector<64x128xf32>
    %27 = arith.cmpf ogt, %14, %26 : vector<64x128xf32>
    %28 = arith.select %27, %14, %25 : vector<64x128xi1>, vector<64x128xf32>
    %c0_14 = arith.constant 0 : index
    %c0_15 = arith.constant 0 : index
    %29 = vector.load %arg6[%c0_14, %c0_15] : memref<32x64xf32, #tpu.memory_space<vmem>>, vector<32x64xf32>
    %cst_16 = arith.constant dense<0.000000e+00> : vector<32x128xf32>
    %30 = tpu.matmul %29, %28, %cst_16 {dimension_numbers = #tpu.dot_dimension_numbers<[1], [0], [0], [1], [0, 0, 1, 1], [], []>} : vector<32x64xf32>, vector<64x128xf32>, vector<32x128xf32> -> vector<32x128xf32>
    %c0_17 = arith.constant 0 : index
    %c0_18 = arith.constant 0 : index
    %31 = vector.load %arg7[%c0_17, %c0_18] : memref<32x1xf32, #tpu.memory_space<vmem>>, vector<32x1xf32>
    %32 = vector.broadcast %31 : vector<32x1xf32> to vector<32x128xf32>
    %33 = arith.addf %30, %32 : vector<32x128xf32>
    %c0_19 = arith.constant 0 : index
    %c0_20 = arith.constant 0 : index
    %34 = vector.load %arg8[%c0_19, %c0_20] : memref<32x128xf32, #tpu.memory_space<vmem>>, vector<32x128xf32>
    tpu.vector_store %arg8[%c0_19, %c0_20], %33 {strides = array<i32>} : memref<32x128xf32, #tpu.memory_space<vmem>>, vector<32x128xf32>,
    return
  }
  func.func @transform_0(%arg0: i32) -> (i32, i32) {
    %c0_i32 = arith.constant 0 : i32
    %c0_i32_0 = arith.constant 0 : i32
    return %c0_i32, %arg0 : i32, i32
  }
  func.func @transform_1(%arg0: i32) -> (i32, i32) {
    %c0_i32 = arith.constant 0 : i32
    %c0_i32_0 = arith.constant 0 : i32
    %c0_i32_1 = arith.constant 0 : i32
    return %c0_i32, %c0_i32_0 : i32, i32
  }
  func.func @transform_2(%arg0: i32) -> (i32, i32) {
    %c0_i32 = arith.constant 0 : i32
    %c0_i32_0 = arith.constant 0 : i32
    %c0_i32_1 = arith.constant 0 : i32
    return %c0_i32, %c0_i32_0 : i32, i32
  }
  func.func @transform_3(%arg0: i32) -> (i32, i32) {
    %c0_i32 = arith.constant 0 : i32
    %c0_i32_0 = arith.constant 0 : i32
    %c0_i32_1 = arith.constant 0 : i32
    return %c0_i32, %c0_i32_0 : i32, i32
  }
  func.func @transform_4(%arg0: i32) -> (i32, i32) {
    %c0_i32 = arith.constant 0 : i32
    %c0_i32_0 = arith.constant 0 : i32
    %c0_i32_1 = arith.constant 0 : i32
    return %c0_i32, %c0_i32_0 : i32, i32
  }
  func.func @transform_5(%arg0: i32) -> (i32, i32) {
    %c0_i32 = arith.constant 0 : i32
    %c0_i32_0 = arith.constant 0 : i32
    %c0_i32_1 = arith.constant 0 : i32
    return %c0_i32, %c0_i32_0 : i32, i32
  }
  func.func @transform_6(%arg0: i32) -> (i32, i32) {
    %c0_i32 = arith.constant 0 : i32
    %c0_i32_0 = arith.constant 0 : i32
    %c0_i32_1 = arith.constant 0 : i32
    return %c0_i32, %c0_i32_0 : i32, i32
  }
  func.func @transform_7(%arg0: i32) -> (i32, i32) {
    %c0_i32 = arith.constant 0 : i32
    %c0_i32_0 = arith.constant 0 : i32
    return %c0_i32, %arg0 : i32, i32
  }
}

</mosaic_0001>

<bundles_post_ra>
// kernel: tpu_custom_call.1
= control target key start
LH: loop header
LB: loop body
LE: loop exit
PB: predicated region body
PF: predicated region fallthrough
CT: control target
= control target key end

     0   :  { %v1154_v1 = vmov 0   ;;  %s1556_s0 = inlined_call_operand.vmem [shape: f32[1,128], index: 0, kind: input, shape index: {}]   ;;  %s1557_s1 = inlined_call_operand.vmem [shape: f32[16,1], index: 1, kind: input, shape index: {}]   ;;  %s1558_s2 = inlined_call_operand.vmem [shape: f32[64,16], index: 2, kind: input, shape index: {}]   ;;  %s1559_s3 = inlined_call_operand.vmem [shape: f32[64,16], index: 3, kind: input, shape index: {}]   ;;  %s1560_s4 = inlined_call_operand.vmem [shape: f32[64,1], index: 4, kind: input, shape index: {}]   ;;  %s1561_s5 = inlined_call_operand.vmem [shape: f32[32,64], index: 5, kind: input, shape index: {}]   ;;  %s1562_s6 = inlined_call_operand.vmem [shape: f32[32,1], index: 6, kind: input, shape index: {}]   ;;  %s1563_s7 = inlined_call_operand.hbm [shape: f32[32,128], index: 7, kind: output, shape index: {}]  }
   0x1   :  { %v29_v0 = vld [vmem:[%s1557_s1 + $0x8] sm:$0xff]  ;;  %1092 = vset.pattern.permute.xlu0 %v1154_v1  ;;  %1093 = vset.pattern.permute.xlu1 %v1154_v1 }
   0x2   :  { %37 = vperm.xlu0 %1092, %v29_v0   ;;  %1094 = vset.pattern.permute.xlu2 %v1154_v1 }
   0x3   :  { %12 = vsyncpa [#allocation3], 0  ;;  %v28_v2 = vld [vmem:[%s1557_s1] sm:$0xff]  ;;  %v813_v3 = vld [vmem:[%s1560_s4 + $0x18] sm:$0xff]  ;;  %v1155_v27 = vmov 2102212464  }
   0x4   :  { %v810_v4 = vld [vmem:[%s1560_s4] sm:$0xff]  ;;  %v960_v5 = vld [vmem:[%s1562_s6 + $0x10] sm:$0xff]  ;;  %v1156_v29 = vmov 920167782   ;;  %v1157_v32 = vmov 683565275  }
   0x5   :  { %v1095_v6 = vld [vmem:[%s1556_s0] ss:$0 sm:$0xff]  ;;  %v1158_v35 = vmov 1326507024   ;;  %v1159_v37 = vmov 2475754826  }
   0x6   :  { %v1160_v41 = vmov 2131351028   ;;  %s1161_s15 = smov [#allocation2]   ;;  %s1034_s19 = sshll.u32 %s1563_s7, 4  ;;  %s1035_s19 = int_to_ptr.hbm [resolvable:$true] %s1034_s19 }
   0x7   :  { %s1032_s16 = sshll.u32 %s1161_s15, 4  ;;  %s1163_s20 = smov 8   ;;  %s1033_s16 = int_to_ptr.vmem [resolvable:$true] %s1032_s16 }
   0xa   :  { %32 = vperm.xlu0 %1092, %v28_v2  }
  0x12   :  { %835 = vperm.xlu0 %1092, %v813_v3  }
  0x1a   :  { %820 = vperm.xlu0 %1092, %v810_v4  }
  0x22   :  { %974 = vperm.xlu0 %1092, %v960_v5  }
  0x74   :  { %v38_v7 = vpop.permute.xlu0 %37 }
  0x75   :  { %v1225_v8 = vmul.f32 %v1095_v6, %v38_v7 }
  0x77   :  { %v203_v9 = vand.u32 2139095040, %v1225_v8  ;;  %v200_v10 = vand.u32 2147483647, %v1225_v8 }
  0x79   :  { %v204_v11 = vshrl.u32 %v203_v9, 23  ;;  %v207_v12 = vand.u32 8388607, %v200_v10 }
  0x7b   :  { %v1049_v13 = vadd.s32 4294967169, %v204_v11  ;;  %v208_v14 = vor.u32 8388608, %v207_v12 }
  0x7c   :  { %v33_v15 = vpop.permute.xlu0 %32 }
  0x7d   :  { %v210_v16 = vadd.s32 1, %v1049_v13  ;;  %v1231_v17 = vmul.f32 %v1095_v6, %v33_v15  ;;  %v1234_v19 = vshll.u32 %v208_v14, 8 }
  0x7f   :  { %vm211_vm0 = vcmp.gt.s32.totalorder %v210_v16, 0  ;;  %v48_v18 = vand.u32 2139095040, %v1231_v17  ;;  %v1239_v25 = vand.u32 65535, %v1234_v19  ;;  %v45_v26 = vand.u32 2147483647, %v1231_v17 }
  0x80   :  { %v212_v20 = vsel %vm211_vm0, %v210_v16, 0  ;;  %v250_v11 = vshrl.u32 %v1234_v19, 16 }
  0x81   :  { %v214_v21 = vand.u32 31, %v212_v20  ;;  %v49_v22 = vshrl.u32 %v48_v18, 23  ;;  %v1236_v23 = vshrl.u32 %v212_v20, 5  ;;  %v1257_v60 = vand.u32 8388607, %v45_v26 }
  0x83   :  { %v215_v24 = vsub.s32 32, %v214_v21  ;;  %v226_v28 = vshll.u32 %v1155_v27, %v214_v21  ;;  %v229_v30 = vshll.u32 %v1156_v29, %v214_v21  ;;  %v1046_v31 = vadd.s32 4294967169, %v49_v22 }
  0x84   :  { %v217_v33 = vshll.u32 %v1157_v32, %v214_v21  ;;  %v220_v39 = vshll.u32 %v1159_v37, %v214_v21  ;;  %v223_v43 = vshll.u32 %v1160_v41, %v214_v21  ;;  %vm235_vm1 = vcmp.lt.s32.totalorder %v1236_v23, 4 }
  0x85   :  { %v227_v34 = vshrl.u32 %v1156_v29, %v215_v24  ;;  %v230_v36 = vshrl.u32 %v1158_v35, %v215_v24  ;;  %v218_v38 = vshrl.u32 %v1159_v37, %v215_v24  ;;  %v55_v40 = vadd.s32 1, %v1046_v31 }
  0x86   :  { %v221_v42 = vshrl.u32 %v1160_v41, %v215_v24  ;;  %v224_v44 = vshrl.u32 %v1155_v27, %v215_v24  ;;  %v216_v48 = vshrl.u32 %v1157_v32, %v215_v24  ;;  %vm232_vm3 = vcmp.lt.s32.totalorder %v1236_v23, 1 }
  0x87   :  { %v228_v45 = vor.u32 %v227_v34, %v226_v28  ;;  %v231_v46 = vor.u32 %v230_v36, %v229_v30  ;;  %v219_v47 = vor.u32 %v218_v38, %v217_v33  ;;  %vm56_vm2 = vcmp.gt.s32.totalorder %v55_v40, 0 }
  0x88   :  { %v222_v49 = vor.u32 %v221_v42, %v220_v39  ;;  %v225_v50 = vor.u32 %v224_v44, %v223_v43  ;;  %v57_v53 = vsel %vm56_vm2, %v55_v40, 0  ;;  %vm234_vm4 = vcmp.lt.s32.totalorder %v1236_v23, 3 }
  0x89   :  { %v241_v51 = vsel %vm235_vm1, %v228_v45, 920167782  ;;  %v245_v52 = vsel %vm235_vm1, %v231_v46, 1326507024  ;;  %v1252_v54 = vand.u32 31, %v57_v53  ;;  %v1259_v61 = vshrl.u32 %v57_v53, 5 }
  0x8a   :  { %v237_v55 = vsel %vm235_vm1, %v225_v50, 2102212464  ;;  %v240_v56 = vsel %vm232_vm3, %v219_v47, %v222_v49  ;;  %v242_v57 = vsel %vm234_vm4, %v225_v50, %v241_v51  ;;  %v244_v58 = vsel %vm232_vm3, %v222_v49, %v225_v50 }
  0x8b   :  { %v246_v59 = vsel %vm234_vm4, %v228_v45, %v245_v52  ;;  %v1262_v62 = vsub.s32 32, %v1252_v54  ;;  %vm233_vm5 = vcmp.lt.s32.totalorder %v1236_v23, 2  ;;  %v236_v63 = vsel %vm232_vm3, %v216_v48, %v219_v47 }
  0x8c   :  { %v74_v0 = vshll.u32 %v1156_v29, %v1252_v54  ;;  %v238_v2 = vsel %vm234_vm4, %v222_v49, %v237_v55  ;;  %v243_v3 = vsel %vm233_vm5, %v240_v56, %v242_v57  ;;  %v247_v4 = vsel %vm233_vm5, %v244_v58, %v246_v59 }
  0x8d   :  { %v72_v5 = vshrl.u32 %v1156_v29, %v1262_v62  ;;  %v75_v6 = vshrl.u32 %v1158_v35, %v1262_v62  ;;  %v251_v7 = vand.u32 65535, %v247_v4  ;;  %v252_v9 = vshrl.u32 %v247_v4, 16 }
  0x8e   :  { %v273_v12 = vand.u32 65535, %v243_v3  ;;  %v274_v13 = vshrl.u32 %v243_v3, 16  ;;  %v71_v14 = vshll.u32 %v1155_v27, %v1252_v54  ;;  %vm80_vm6 = vcmp.lt.s32.totalorder %v1259_v61, 4 }
  0x8f   :  { %v76_v15 = vor.u32 %v75_v6, %v74_v0  ;;  %v254_v16 = vmul.u32 %v252_v9, %v1239_v25  ;;  %v1279_v18 = vsel %vm233_vm5, %v236_v63, %v238_v2  ;;  %v255_v20 = vmul.u32 %v251_v7, %v250_v11 }
  0x90   :  { %v276_v21 = vmul.u32 %v274_v13, %v1239_v25  ;;  %v53_v22 = vor.u32 8388608, %v1257_v60  ;;  %v73_v24 = vor.u32 %v72_v5, %v71_v14  ;;  %v253_v28 = vmul.u32 %v251_v7, %v1239_v25 }
  0x91   :  { %v256_v29 = vmul.u32 %v252_v9, %v250_v11  ;;  %v257_v30 = vshll.u32 %v254_v16, 16  ;;  %v90_v31 = vsel %vm80_vm6, %v76_v15, 1326507024  ;;  %v258_v33 = vshrl.u32 %v254_v16, 16 }
  0x92   :  { %v275_v34 = vmul.u32 %v273_v12, %v1239_v25  ;;  %v277_v35 = vmul.u32 %v273_v12, %v250_v11  ;;  %v259_v23 = vshll.u32 %v255_v20, 16  ;;  %v279_v38 = vshll.u32 %v276_v21, 16 }
  0x93   :  { %vm261_vm7 = vc.u32 %v253_v28, %v257_v30  ;;  %v263_v36 = vadd.s32 %v257_v30, %v253_v28  ;;  %v260_v39 = vshrl.u32 %v255_v20, 16  ;;  %v278_v42 = vmul.u32 %v274_v13, %v250_v11 }
  0x94   :  { %v262_v40 = vsel %vm261_vm7, 1, %v1154_v1  ;;  %v281_v43 = vshll.u32 %v277_v35, 16  ;;  %vm283_vm9 = vc.u32 %v275_v34, %v279_v38  ;;  %v285_v45 = vadd.s32 %v279_v38, %v275_v34 }
  0x95   :  { %v264_v44 = vadd.s32 %v262_v40, %v256_v29  ;;  %vm265_vm8 = vc.u32 %v263_v36, %v259_v23  ;;  %v284_v47 = vsel %vm283_vm9, 1, %v1154_v1  ;;  %v62_v25 = vshll.u32 %v1157_v32, %v1252_v54 }
  0x96   :  { %v266_v46 = vsel %vm265_vm8, 1, %v1154_v1  ;;  %v63_v48 = vshrl.u32 %v1159_v37, %v1262_v62  ;;  %v280_v50 = vshrl.u32 %v276_v21, 16  ;;  %v286_v51 = vadd.s32 %v284_v47, %v278_v42 }
  0x97   :  { %v268_v49 = vadd.s32 %v266_v46, %v264_v44  ;;  %vm287_vm10 = vc.u32 %v285_v45, %v281_v43  ;;  %v65_v55 = vshll.u32 %v1159_v37, %v1252_v54  ;;  %v66_v56 = vshrl.u32 %v1160_v41, %v1262_v62 }
  0x98   :  { %v288_v52 = vsel %vm287_vm10, 1, %v1154_v1  ;;  %v1295_v53 = vor.u32 %v63_v48, %v62_v25  ;;  %v68_v59 = vshll.u32 %v1160_v41, %v1252_v54  ;;  %v69_v60 = vshrl.u32 %v1155_v27, %v1262_v62 }
  0x99   :  { %v269_v57 = vadd.s32 %v268_v49, %v258_v33  ;;  %v290_v58 = vadd.s32 %v288_v52, %v286_v51  ;;  %v86_v63 = vsel %vm80_vm6, %v73_v24, 920167782  ;;  %v282_v0 = vshrl.u32 %v277_v35, 16 }
  0x9a   :  { %v1307_v2 = vor.u32 %v66_v56, %v65_v55  ;;  %vm77_vm11 = vcmp.lt.s32.totalorder %v1259_v61, 1  ;;  %v70_v4 = vor.u32 %v69_v60, %v68_v59  ;;  %vm79_vm12 = vcmp.lt.s32.totalorder %v1259_v61, 3 }
  0x9b   :  { %v1310_v37 = vadd.s32 %v269_v57, %v260_v39  ;;  %v291_v3 = vadd.s32 %v290_v58, %v280_v50  ;;  %v1313_v5 = vadd.s32 %v285_v45, %v281_v43  ;;  %v91_v41 = vsel %vm79_vm12, %v73_v24, %v90_v31 }
  0x9c   :  { %v85_v27 = vsel %vm77_vm11, %v1295_v53, %v1307_v2  ;;  %v1321_v54 = vshll.u32 %v53_v22, 8  ;;  %v293_v7 = vmul.u32 %v1234_v19, %v1279_v18  ;;  %vm78_vm14 = vcmp.lt.s32.totalorder %v1259_v61, 2 }
  0x9d   :  { %v292_v6 = vadd.s32 %v291_v3, %v282_v0  ;;  %vm295_vm13 = vc.u32 %v1310_v37, %v1313_v5  ;;  %v87_v9 = vsel %vm79_vm12, %v70_v4, %v86_v63  ;;  %v89_v11 = vsel %vm77_vm11, %v1307_v2, %v70_v4 }
  0x9e   :  { %v88_v13 = vsel %vm78_vm14, %v85_v27, %v87_v9  ;;  %v92_v14 = vsel %vm78_vm14, %v89_v11, %v91_v41  ;;  %v94_v19 = vand.u32 65535, %v1321_v54  ;;  %v95_v15 = vshrl.u32 %v1321_v54, 16 }
  0x9f   :  { %v296_v12 = vadd.s32 1, %v292_v6  ;;  %v96_v16 = vand.u32 65535, %v92_v14  ;;  %v97_v18 = vshrl.u32 %v92_v14, 16  ;;  %v118_v20 = vand.u32 65535, %v88_v13 }
  0xa0   :  { %v119_v22 = vshrl.u32 %v88_v13, 16  ;;  %v61_v58 = vshrl.u32 %v1157_v32, %v1262_v62  ;;  %v82_v59 = vsel %vm80_vm6, %v70_v4, 2102212464  ;;  %vm202_vm7 = vcmp.lt.s32.totalorder %v1225_v8, 0 }
  0xa1   :  { %v297_v21 = vsel %vm295_vm13, %v296_v12, %v292_v6  ;;  %v99_v28 = vmul.u32 %v97_v18, %v94_v19  ;;  %v100_v29 = vmul.u32 %v96_v16, %v95_v15  ;;  %v122_v31 = vmul.u32 %v118_v20, %v95_v15 }
  0xa2   :  { %v298_v24 = vadd.s32 %v297_v21, %v293_v7  ;;  %v121_v30 = vmul.u32 %v119_v22, %v94_v19  ;;  %v98_v34 = vmul.u32 %v96_v16, %v94_v19  ;;  %v101_v23 = vmul.u32 %v97_v18, %v95_v15 }
  0xa3   :  { %v102_v35 = vshll.u32 %v99_v28, 16  ;;  %v120_v36 = vmul.u32 %v118_v20, %v94_v19  ;;  %v104_v40 = vshll.u32 %v100_v29, 16  ;;  %v126_v44 = vshll.u32 %v122_v31, 16 }
  0xa4   :  { %v299_v33 = vadd.s32 536870912, %v298_v24  ;;  %v124_v38 = vshll.u32 %v121_v30, 16  ;;  %v123_v25 = vmul.u32 %v119_v22, %v95_v15  ;;  %v103_v55 = vshrl.u32 %v99_v28, 16 }
  0xa5   :  { %vm106_vm15 = vc.u32 %v98_v34, %v102_v35  ;;  %v108_v42 = vadd.s32 %v102_v35, %v98_v34  ;;  %v105_v60 = vshrl.u32 %v100_v29, 16  ;;  %v125_v0 = vshrl.u32 %v121_v30, 16 }
  0xa6   :  { %v1339_v39 = vshrl.u32 %v299_v33, 30  ;;  %v107_v43 = vsel %vm106_vm15, 1, %v1154_v1  ;;  %vm128_vm0 = vc.u32 %v120_v36, %v124_v38  ;;  %v130_v45 = vadd.s32 %v124_v38, %v120_v36 }
  0xa7   :  { %v109_v47 = vadd.s32 %v107_v43, %v101_v23  ;;  %vm110_vm1 = vc.u32 %v108_v42, %v104_v40  ;;  %v129_v49 = vsel %vm128_vm0, 1, %v1154_v1  ;;  %v81_v41 = vsel %vm77_vm11, %v61_v58, %v1295_v53 }
  0xa8   :  { %v301_v46 = vshll.u32 %v1339_v39, 30  ;;  %v111_v48 = vsel %vm110_vm1, 1, %v1154_v1  ;;  %vm132_vm2 = vc.u32 %v130_v45, %v126_v44  ;;  %v131_v52 = vadd.s32 %v129_v49, %v123_v25 }
  0xa9   :  { %v113_v51 = vadd.s32 %v111_v48, %v109_v47  ;;  %v133_v56 = vsel %vm132_vm2, 1, %v1154_v1  ;;  %v83_v1 = vsel %vm79_vm12, %v1307_v2, %v82_v59  ;;  %v127_v32 = vshrl.u32 %v122_v31, 16 }
  0xaa   :  { %v302_v50 = vsub.s32 %v298_v24, %v301_v46  ;;  %v135_v3 = vadd.s32 %v133_v56, %v131_v52  ;;  %v134_v11 = vadd.s32 %v130_v45, %v126_v44  ;;  %v84_v4 = vsel %vm78_vm14, %v81_v41, %v83_v1 }
  0xab   :  { %v114_v63 = vadd.s32 %v113_v51, %v103_v55  ;;  %v294_v53 = vadd.s32 %v1313_v5, %v1310_v37  ;;  %v138_v2 = vmul.u32 %v1321_v54, %v84_v4  ;;  %vm1367_vm8 = vcmp.le.f32.partialorder %v200_v10, 0.7853982 }
  0xac   :  { %vm303_vm3 = vcmp.lt.s32.totalorder %v302_v50, 0  ;;  %v304_v57 = vsub.s32 0, %v302_v50  ;;  %v136_v9 = vadd.s32 %v135_v3, %v125_v0  ;;  %v324_v40 = vsub.s32 4, %v1339_v39 }
  0xad   :  { %v115_v7 = vadd.s32 %v114_v63, %v105_v60  ;;  %vm343_vm10 = vweird.f32 %v1225_v8  ;;  %vm47_vm11 = vcmp.lt.s32.totalorder %v1231_v17, 0  ;;  %vm1382_vm2 = vcmp.le.f32.partialorder %v45_v26, 0.7853982  ;;  %v817_v26 = vld [vmem:[%s1560_s4 + $0x38] sm:$0xff] }
  0xae   :  { %v305_v27 = vsel %vm303_vm3, %v304_v57, %v302_v50  ;;  %v137_v12 = vadd.s32 %v136_v9, %v127_v32  ;;  %v325_v25 = vsel %vm202_vm7, %v324_v40, %v1339_v39  ;;  %855 = vperm.xlu1 %1093, %v817_v26  }
  0xaf   :  { %v306_v6 = vclz %v305_v27  ;;  %vm140_vm5 = vc.u32 %v115_v7, %v134_v11  ;;  %v327_v55 = vsel %vm1367_vm8, 0, %v325_v25 }
  0xb0   :  { %v141_v14 = vadd.s32 1, %v137_v12  ;;  %v344_v3 = vadd.s32 3, %v327_v55  ;;  %v653_v32 = vand.u32 3, %v327_v55 }
  0xb1   :  { %v1050_v62 = vadd.s32 4294967294, %v306_v6 }
  0xb2   :  { %v142_v16 = vsel %vm140_vm5, %v141_v14, %v137_v12  ;;  %vm654_vm12 = vcmp.lt.s32.totalorder %v653_v32, 2  ;;  %vm655_vm13 = vcmp.eq.s32.totalorder %v653_v32, 0  ;;  %vm658_vm14 = vcmp.eq.s32.totalorder %v653_v32, 2  ;;  %v673_v32 = vld [vmem:[%s1559_s3 + $0x10] sm:$0xff] }
  0xb3   :  { %vm1051_vm4 = vcmp.lt.s32.totalorder %v1050_v62, 0  ;;  %v143_v22 = vadd.s32 %v142_v16, %v138_v2 }
  0xb4   :  { %v309_v13 = vsel %vm1051_vm4, 0, %v1050_v62  ;;  %v345_v62 = vand.u32 3, %v344_v3  ;;  %v677_v3 = vld [vmem:[%s1559_s3 + $0x30] sm:$0xff] }
  0xb5   :  { %v310_v19 = vsub.s32 32, %v309_v13  ;;  %v314_v15 = vsub.s32 4294967266, %v309_v13  ;;  %v311_v18 = vshll.u32 %v302_v50, %v309_v13  ;;  %v144_v28 = vadd.s32 536870912, %v143_v22 }
  0xb6   :  { %v139_v50 = vadd.s32 %v134_v11, %v115_v7  ;;  %vm346_vm15 = vcmp.lt.s32.totalorder %v345_v62, 2  ;;  %vm347_vm0 = vcmp.eq.s32.totalorder %v345_v62, 0  ;;  %vm350_vm1 = vcmp.eq.s32.totalorder %v345_v62, 2  ;;  %v665_v62 = vld [vmem:[%s1558_s2 + $0x10] sm:$0xff] }
  0xb7   :  { %v312_v20 = vshrl.u32 %v294_v53, %v310_v19  ;;  %v315_v21 = vadd.s32 127, %v314_v15  ;;  %v1361_v30 = vshrl.u32 %v144_v28, 30 }
  0xb9   :  { %v313_v24 = vor.u32 %v312_v20, %v311_v18  ;;  %v316_v61 = vshll.u32 %v315_v21, 23  ;;  %v146_v34 = vshll.u32 %v1361_v30, 30 }
  0xbb   :  { %v317_v29 = vor.u32 4788187, %v316_v61  ;;  %v320_v33 = vcvt.s32.f32 %v313_v24  ;;  %v147_v5 = vsub.s32 %v143_v22, %v146_v34 }
  0xbd   :  { %v318_v31 = vand.u32 2147483647, %v317_v29  ;;  %vm148_vm6 = vcmp.lt.s32.totalorder %v147_v5, 0  ;;  %v149_v54 = vsub.s32 0, %v147_v5  ;;  %v169_v29 = vsub.s32 4, %v1361_v30 }
  0xbf   :  { %v321_v37 = vmul.f32 %v320_v33, %v318_v31  ;;  %v150_v38 = vsel %vm148_vm6, %v149_v54, %v147_v5 }
  0xc0   :  { %v151_v43 = vclz %v150_v38  ;;  %v816_v38 = vld [vmem:[%s1560_s4 + $0x30] sm:$0xff] }
  0xc1   :  { %v322_v35 = vxor.u32 2147483648, %v321_v37  ;;  %850 = vperm.xlu1 %1093, %v816_v38  }
  0xc2   :  { %v1047_v45 = vadd.s32 4294967294, %v151_v43 }
  0xc3   :  { %v323_v36 = vsel %vm202_vm7, %v322_v35, %v321_v37 }
  0xc4   :  { %v326_v42 = vsel %vm1367_vm8, %v1225_v8, %v323_v36  ;;  %vm1048_vm9 = vcmp.lt.s32.totalorder %v1047_v45, 0  ;;  %v170_v8 = vsel %vm47_vm11, %v169_v29, %v1361_v30 }
  0xc5   :  { %v328_v44 = vmul.f32 %v326_v42, %v326_v42  ;;  %v154_v49 = vsel %vm1048_vm9, 0, %v1047_v45  ;;  %v172_v54 = vsel %vm1382_vm2, 0, %v170_v8  ;;  %vm188_vm9 = vweird.f32 %v1231_v17 }
  0xc6   :  { %v155_v51 = vsub.s32 32, %v154_v49  ;;  %v159_v52 = vsub.s32 4294967266, %v154_v49  ;;  %v156_v58 = vshll.u32 %v147_v5, %v154_v49  ;;  %v189_v43 = vadd.s32 3, %v172_v54  ;;  %v812_v49 = vld [vmem:[%s1560_s4 + $0x10] sm:$0xff] }
  0xc7   :  { %v329_v46 = vmul.f32 -0.001358992, %v328_v44  ;;  %v336_v47 = vmul.f32 -0.00019511016, %v328_v44  ;;  %v499_v30 = vand.u32 3, %v172_v54 }
  0xc8   :  { %v157_v59 = vshrl.u32 %v139_v50, %v155_v51  ;;  %v160_v60 = vadd.s32 127, %v159_v52  ;;  %v190_v25 = vand.u32 3, %v189_v43  ;;  %v815_v50 = vld [vmem:[%s1560_s4 + $0x28] sm:$0xff] }
  0xc9   :  { %v330_v10 = vadd.f32 0.041655596, %v329_v46  ;;  %v337_v48 = vadd.f32 0.008332121, %v336_v47  ;;  %vm500_vm3 = vcmp.lt.s32.totalorder %v499_v30, 2  ;;  %vm501_vm4 = vcmp.eq.s32.totalorder %v499_v30, 0  ;;  %845 = vperm.xlu2 %1094, %v815_v50   ;;  %830 = vperm.xlu1 %1093, %v812_v49  }
  0xca   :  { %v158_v27 = vor.u32 %v157_v59, %v156_v58  ;;  %v161_v39 = vshll.u32 %v160_v60, 23  ;;  %vm504_vm5 = vcmp.eq.s32.totalorder %v499_v30, 2  ;;  %vm191_vm6 = vcmp.lt.s32.totalorder %v190_v25, 2  ;;  %v671_v60 = vld [vmem:[%s1559_s3] sm:$0xff] }
  0xcb   :  { %v331_v56 = vmul.f32 %v330_v10, %v328_v44  ;;  %v338_v57 = vmul.f32 %v337_v48, %v328_v44  ;;  %vm192_vm7 = vcmp.eq.s32.totalorder %v190_v25, 0  ;;  %vm195_vm8 = vcmp.eq.s32.totalorder %v190_v25, 2 }
  0xcc   :  { %v162_v1 = vor.u32 4788187, %v161_v39  ;;  %v165_v4 = vcvt.s32.f32 %v158_v27  ;;  %v663_v27 = vld [vmem:[%s1558_s2] sm:$0xff] }
  0xcd   :  { %v332_v63 = vadd.f32 -0.4999988, %v331_v56  ;;  %v339_v0 = vadd.f32 -0.16666654, %v338_v57  ;;  %v814_v39 = vld [vmem:[%s1560_s4 + $0x20] sm:$0xff] }
  0xce   :  { %v163_v11 = vand.u32 2147483647, %v162_v1  ;;  %v664_v1 = vld [vmem:[%s1558_s2 + $0x8] sm:$0xff] }
  0xcf   :  { %v333_v41 = vmul.f32 %v332_v63, %v328_v44  ;;  %v340_v6 = vmul.f32 %v339_v0, %v328_v44 }
  0xd0   :  { %v166_v14 = vmul.f32 %v165_v4, %v163_v11  ;;  %v669_v11 = vld [vmem:[%s1558_s2 + $0x30] sm:$0xff]  ;;  %v959_v4 = vld [vmem:[%s1562_s6 + $0x8] sm:$0xff] }
  0xd1   :  { %v334_v9 = vadd.f32 1.0, %v333_v41  ;;  %v341_v7 = vadd.f32 1.0, %v340_v6  ;;  %840 = vperm.xlu2 %1094, %v814_v39   ;;  %v672_v41 = vld [vmem:[%s1559_s3 + $0x8] sm:$0xff]  ;;  %v678_v6 = vld [vmem:[%s1559_s3 + $0x38] sm:$0xff] }
  0xd2   :  { %v167_v19 = vxor.u32 2147483648, %v166_v14 }
  0xd3   :  { %v342_v12 = vmul.f32 %v341_v7, %v326_v42  ;;  %v351_v13 = vxor.u32 2147483648, %v334_v9  ;;  %v811_v7 = vld [vmem:[%s1560_s4 + $0x8] sm:$0xff] }
  0xd4   :  { %v168_v24 = vsel %vm47_vm11, %v167_v19, %v166_v14  ;;  %v670_v14 = vld [vmem:[%s1558_s2 + $0x38] sm:$0xff]  ;;  %v667_v19 = vld [vmem:[%s1558_s2 + $0x20] sm:$0xff] }
  0xd5   :  { %v348_v53 = vxor.u32 2147483648, %v342_v12  ;;  %v660_v2 = vsel %vm658_vm14, %v351_v13, %v342_v12  ;;  %v352_v18 = vsel %vm350_vm1, %v351_v13, %v342_v12  ;;  %v171_v31 = vsel %vm1382_vm2, %v1231_v17, %v168_v24  ;;  %v958_v17 = vld [vmem:[%s1562_s6] sm:$0xff]  ;;  %v674_v12 = vld [vmem:[%s1559_s3 + $0x18] sm:$0xff] }
  0xd6   :  { %v173_v33 = vmul.f32 %v171_v31, %v171_v31  ;;  %964 = vperm.xlu1 %1093, %v958_v17   ;;  %v666_v13 = vld [vmem:[%s1558_s2 + $0x18] sm:$0xff] }
  0xd7   :  { %v657_v15 = vsel %vm655_vm13, %v334_v9, %v348_v53  ;;  %v349_v16 = vsel %vm347_vm0, %v334_v9, %v348_v53  ;;  %v961_v9 = vld [vmem:[%s1562_s6 + $0x18] sm:$0xff]  ;;  %v675_v53 = vld [vmem:[%s1559_s3 + $0x20] sm:$0xff] }
  0xd8   :  { %v661_v20 = vsel %vm654_vm12, %v657_v15, %v660_v2  ;;  %v353_v21 = vsel %vm346_vm15, %v349_v16, %v352_v18  ;;  %v174_v34 = vmul.f32 -0.001358992, %v173_v33  ;;  %v181_v37 = vmul.f32 -0.00019511016, %v173_v33  ;;  %v676_v15 = vld [vmem:[%s1559_s3 + $0x28] sm:$0xff] }
  0xd9   :  { %v662_v61 = vsel %vm343_vm10, nan, %v661_v20  ;;  %v354_v28 = vsel %vm343_vm10, nan, %v353_v21  ;;  %vm679_vm10 = vcmask 130048   ;;  %825 = vperm.xlu2 %1094, %v811_v7   ;;  %v668_v2 = vld [vmem:[%s1558_s2 + $0x28] sm:$0xff] }
  0xda   :  { %718 = vmatpush.msra.mxu0 %v662_v61  ;;  %1078 = vmatpush.msra.mxu3 %v662_v61  ;;  %v175_v5 = vadd.f32 0.041655596, %v174_v34  ;;  %v182_v35 = vadd.f32 0.008332121, %v181_v37  ;;  %v836_v37 = vpop.permute.xlu0 %835 }
  0xdb   :  { %783 = vmatpush.msra.mxu1 %v354_v28 }
  0xdc   :  { %v176_v23 = vmul.f32 %v175_v5, %v173_v33  ;;  %v183_v36 = vmul.f32 %v182_v35, %v173_v33 }
  0xde   :  { %v177_v40 = vadd.f32 -0.4999988, %v176_v23  ;;  %v184_v42 = vadd.f32 -0.16666654, %v183_v36  ;;  %979 = vperm.xlu1 %1093, %v961_v9  }
  0xe0   :  { %v178_v44 = vmul.f32 %v177_v40, %v173_v33  ;;  %v185_v45 = vmul.f32 %v184_v42, %v173_v33 }
  0xe1   :  { %969 = vperm.xlu2 %1094, %v959_v4  }
  0xe2   :  { %v179_v46 = vadd.f32 1.0, %v178_v44  ;;  %v186_v47 = vadd.f32 1.0, %v185_v45  ;;  %v821_v50 = vpop.permute.xlu0 %820 }
  0xe4   :  { %v187_v10 = vmul.f32 %v186_v47, %v171_v31  ;;  %v196_v48 = vxor.u32 2147483648, %v179_v46 }
  0xe6   :  { %v193_v51 = vxor.u32 2147483648, %v187_v10  ;;  %v506_v55 = vsel %vm504_vm5, %v196_v48, %v187_v10  ;;  %v197_v57 = vsel %vm195_vm8, %v196_v48, %v187_v10 }
  0xe8   :  { %v503_v52 = vsel %vm501_vm4, %v179_v46, %v193_v51  ;;  %v194_v56 = vsel %vm192_vm7, %v179_v46, %v193_v51 }
  0xe9   :  { %v507_v58 = vsel %vm500_vm3, %v503_v52, %v506_v55  ;;  %v198_v59 = vsel %vm191_vm6, %v194_v56, %v197_v57  ;;  %vm982_vm3 = vcmask 523264  }
  0xea   :  { %v508_v63 = vsel %vm188_vm9, nan, %v507_v58  ;;  %v199_v0 = vsel %vm188_vm9, nan, %v198_v59 }
  0xeb   :  { %719 = vmatpush.msra.mxu0 %v508_v63  ;;  %1079 = vmatpush.msra.mxu3 %v508_v63 }
  0xec   :  { %784 = vmatpush.msra.mxu1 %v199_v0  ;;  %1058 = vmatmul.msk.f32.vlgmr.msra.gmra.mxu0 %vm679_vm10, %v671_v60 }
  0xed   :  { %1064 = vmatmul.msk.f32.vlgmr.msra.gmra.mxu3 %vm679_vm10, %v677_v3  ;;  %1066 = vmatmul.msk.f32.vlgmr.msra.gmra.mxu1 %vm679_vm10, %v663_v27 }
  0xee   :  { %1080 = vmatpush.msrb.mxu3 %v354_v28 }
  0xf0   :  { %1081 = vmatpush.msrb.mxu3 %v199_v0 }
  0xf4   :  { %1059 = vmatmul.msk.f32.gmra.mxu0 %vm679_vm10, %v672_v41 }
  0xf5   :  { %1065 = vmatmul.msk.f32.gmra.mxu3 %vm679_vm10, %v678_v6  ;;  %1067 = vmatmul.msk.f32.gmra.mxu1 %vm679_vm10, %v664_v1 }
  0xfc   :  { %1060 = vmatmul.msk.f32.gmra.mxu0 %vm679_vm10, %v673_v32 }
  0xfd   :  { %1068 = vmatmul.msk.f32.gmra.mxu1 %vm679_vm10, %v665_v62  ;;  %1072 = vmatmul.msk.f32.vlgmr.msrb.gmra.mxu3 %vm679_vm10, %v669_v11 }
 0x104   :  { %1061 = vmatmul.msk.f32.gmra.mxu0 %vm679_vm10, %v674_v12 }
 0x105   :  { %1069 = vmatmul.msk.f32.gmra.mxu1 %vm679_vm10, %v666_v13  ;;  %1073 = vmatmul.msk.f32.gmra.mxu3 %vm679_vm10, %v670_v14 }
 0x10c   :  { %1062 = vmatmul.msk.f32.gmra.mxu0 %vm679_vm10, %v675_v53 }
 0x10d   :  { %1070 = vmatmul.msk.f32.gmra.mxu1 %vm679_vm10, %v667_v19 }
 0x114   :  { %1063 = vmatmul.msk.f32.gmra.mxu0 %vm679_vm10, %v676_v15 }
 0x115   :  { %1071 = vmatmul.msk.f32.gmra.mxu1 %vm679_vm10, %v668_v2 }
 0x120   :  { %v856_v61 = vpop.permute.xlu1 %855 }
 0x123   :  { %v846_v24 = vpop.permute.xlu2 %845 }
 0x12b   :  { %v841_v26 = vpop.permute.xlu2 %840 }
 0x133   :  { %v851_v33 = vpop.permute.xlu1 %850  ;;  %v826_v43 = vpop.permute.xlu2 %825 }
 0x13b   :  { %v831_v46 = vpop.permute.xlu1 %830 }
 0x169   :  { %v721_v16 = vpop.f32.mrf.mxu0 }
 0x16a   :  { %v786_v18 = vpop.f32.mrf.mxu1 }
 0x16b   :  { %v787_v45 = vadd.f32 %v786_v18, %v721_v16 }
 0x16d   :  { %v1505_v56 = vadd.f32 %v821_v50, %v787_v45 }
 0x16f   :  { %v866_v17 = vmin.f32 %v1505_v56, 20.0  ;;  %vm938_vm2 = vcmp.gt.f32.partialorder %v1505_v56, 20.0 }
 0x170   :  { %v739_v20 = vpop.f32.mrf.mxu3 }
 0x171   :  { %v724_v21 = vpop.f32.mrf.mxu0  ;;  %v874_v62 = vmul.f32 1.442695, %v866_v17 }
 0x172   :  { %v789_v22 = vpop.f32.mrf.mxu1 }
 0x173   :  { %v790_v42 = vadd.f32 %v789_v22, %v724_v21 }
 0x175   :  { %v1501_v51 = vadd.f32 %v826_v43, %v790_v42 }
 0x177   :  { %v867_v0 = vmin.f32 %v1501_v51, 20.0  ;;  %vm939_vm1 = vcmp.gt.f32.partialorder %v1501_v51, 20.0 }
 0x178   :  { %v742_v28 = vpop.f32.mrf.mxu3 }
 0x179   :  { %v727_v29 = vpop.f32.mrf.mxu0  ;;  %v876_v7 = vmul.f32 1.442695, %v867_v0 }
 0x17a   :  { %v792_v31 = vpop.f32.mrf.mxu1 }
 0x17b   :  { %v793_v36 = vadd.f32 %v792_v31, %v727_v29 }
 0x17d   :  { %v1498_v30 = vadd.f32 %v831_v46, %v793_v36 }
 0x17f   :  { %v868_v57 = vmin.f32 %v1498_v30, 20.0  ;;  %vm940_vm0 = vcmp.gt.f32.partialorder %v1498_v30, 20.0 }
 0x180   :  { %v804_v34 = vpop.f32.mrf.mxu3 }
 0x181   :  { %v805_v8 = vadd.f32 %v804_v34, %v739_v20  ;;  %v730_v5 = vpop.f32.mrf.mxu0  ;;  %v878_v41 = vmul.f32 1.442695, %v868_v57 }
 0x182   :  { %v795_v35 = vpop.f32.mrf.mxu1 }
 0x183   :  { %v1493_v54 = vadd.f32 %v851_v33, %v805_v8  ;;  %v796_v23 = vadd.f32 %v795_v35, %v730_v5 }
 0x185   :  { %v872_v38 = vmin.f32 %v1493_v54, 20.0  ;;  %v1496_v40 = vadd.f32 %v836_v37, %v796_v23  ;;  %vm944_vm12 = vcmp.gt.f32.partialorder %v1493_v54, 20.0 }
 0x187   :  { %v886_v44 = vmul.f32 1.442695, %v872_v38  ;;  %v869_v48 = vmin.f32 %v1496_v40, 20.0  ;;  %vm941_vm15 = vcmp.gt.f32.partialorder %v1496_v40, 20.0 }
 0x188   :  { %v807_v47 = vpop.f32.mrf.mxu3 }
 0x189   :  { %1096 = vpow2.f32 %v886_v44  ;;  %v808_v25 = vadd.f32 %v807_v47, %v742_v28  ;;  %v733_v10 = vpop.f32.mrf.mxu0  ;;  %v880_v60 = vmul.f32 1.442695, %v869_v48 }
 0x18a   :  { %v798_v49 = vpop.f32.mrf.mxu1 }
 0x18b   :  { %v1503_v52 = vadd.f32 %v856_v61, %v808_v25  ;;  %v799_v55 = vadd.f32 %v798_v49, %v733_v10 }
 0x18d   :  { %v873_v58 = vmin.f32 %v1503_v52, 20.0  ;;  %v1509_v59 = vadd.f32 %v841_v26, %v799_v55  ;;  %vm945_vm11 = vcmp.gt.f32.partialorder %v1503_v52, 20.0 }
 0x18f   :  { %v1097_v63 = vpop.eup %1096  ;;  %v888_v3 = vmul.f32 1.442695, %v873_v58  ;;  %v870_v27 = vmin.f32 %v1509_v59, 20.0  ;;  %vm942_vm14 = vcmp.gt.f32.partialorder %v1509_v59, 20.0 }
 0x190   :  { %v896_v39 = vadd.f32 2.0, %v1097_v63 }
 0x191   :  { %1098 = vpow2.f32 %v888_v3  ;;  %v882_v6 = vmul.f32 1.442695, %v870_v27  ;;  %v736_v1 = vpop.f32.mrf.mxu0 }
 0x192   :  { %1100 = vpow2.f32 %v880_v60  ;;  %v801_v9 = vpop.f32.mrf.mxu1  ;;  %v904_v11 = vmul.f32 %v1097_v63, %v896_v39 }
 0x193   :  { %1102 = vpow2.f32 %v882_v6  ;;  %v802_v32 = vadd.f32 %v801_v9, %v736_v1 }
 0x194   :  { %1104 = vpow2.f32 %v878_v41  ;;  %v920_v19 = vadd.f32 2.0, %v904_v11  ;;  %v912_v36 = vmul.f32 %v904_v11, %v1493_v54 }
 0x195   :  { %v1514_v4 = vadd.f32 %v846_v24, %v802_v32  ;;  %1106 = vpow2.f32 %v876_v7 }
 0x196   :  { %1108 = vpow2.f32 %v874_v62 }
 0x197   :  { %v1099_v12 = vpop.eup %1098  ;;  %v871_v13 = vmin.f32 %v1514_v4, 20.0  ;;  %vm943_vm13 = vcmp.gt.f32.partialorder %v1514_v4, 20.0 }
 0x198   :  { %v1101_v14 = vpop.eup %1100  ;;  %v897_v53 = vadd.f32 2.0, %v1099_v12 }
 0x199   :  { %v1103_v15 = vpop.eup %1102  ;;  %v884_v2 = vmul.f32 1.442695, %v871_v13  ;;  %v893_v21 = vadd.f32 2.0, %v1101_v14 }
 0x19a   :  { %v905_v16 = vmul.f32 %v1099_v12, %v897_v53  ;;  %v894_v18 = vadd.f32 2.0, %v1103_v15  ;;  %v1105_v20 = vpop.eup %1104  ;;  %v957_v53 = vld [vmem:[%s1561_s5 + $0x18] sm:$0xff] }
 0x19b   :  { %1110 = vpow2.f32 %v884_v2  ;;  %v1107_v61 = vpop.eup %1106  ;;  %v892_v29 = vadd.f32 2.0, %v1105_v20  ;;  %v901_v31 = vmul.f32 %v1101_v14, %v893_v21  ;;  %v970_v2 = vpop.permute.xlu2 %969 }
 0x19c   :  { %v921_v22 = vadd.f32 2.0, %v905_v16  ;;  %1112 = vrcp.f32 %v920_v19  ;;  %v1109_v24 = vpop.eup %1108  ;;  %v902_v28 = vmul.f32 %v1103_v15, %v894_v18  ;;  %v891_v26 = vadd.f32 2.0, %v1107_v61  ;;  %v965_v19 = vpop.permute.xlu1 %964 }
 0x19d   :  { %v890_v34 = vadd.f32 2.0, %v1109_v24  ;;  %v900_v35 = vmul.f32 %v1105_v20, %v892_v29  ;;  %v913_v23 = vmul.f32 %v905_v16, %v1503_v52  ;;  %v917_v38 = vadd.f32 2.0, %v901_v31  ;;  %v975_v20 = vpop.permute.xlu0 %974 }
 0x19e   :  { %1114 = vrcp.f32 %v921_v22  ;;  %v918_v5 = vadd.f32 2.0, %v902_v28  ;;  %v899_v44 = vmul.f32 %v1107_v61, %v891_v26  ;;  %v910_v63 = vmul.f32 %v902_v28, %v1509_v59 }
 0x19f   :  { %v898_v47 = vmul.f32 %v1109_v24, %v890_v34  ;;  %v916_v10 = vadd.f32 2.0, %v900_v35  ;;  %v909_v27 = vmul.f32 %v901_v31, %v1496_v40  ;;  %v908_v41 = vmul.f32 %v900_v35, %v1498_v30 }
 0x1a0   :  { %1116 = vrcp.f32 %v918_v5  ;;  %v915_v49 = vadd.f32 2.0, %v899_v44  ;;  %v907_v7 = vmul.f32 %v899_v44, %v1501_v51 }
 0x1a1   :  { %v1111_v33 = vpop.eup %1110  ;;  %1118 = vrcp.f32 %v917_v38  ;;  %v914_v55 = vadd.f32 2.0, %v898_v47 }
 0x1a2   :  { %v1113_v37 = vpop.eup %1112  ;;  %v895_v8 = vadd.f32 2.0, %v1111_v33 }
 0x1a3   :  { %v936_v46 = vmul.f32 %v1113_v37, %v912_v36 }
 0x1a4   :  { %v1115_v42 = vpop.eup %1114  ;;  %v903_v43 = vmul.f32 %v1111_v33, %v895_v8  ;;  %v980_v61 = vpop.permute.xlu1 %979 }
 0x1a5   :  { %v937_v45 = vmul.f32 %v1115_v42, %v913_v23  ;;  %v952_v50 = vsel %vm944_vm12, %v1493_v54, %v936_v46 }
 0x1a6   :  { %v919_v25 = vadd.f32 2.0, %v903_v43  ;;  %v1117_v57 = vpop.eup %1116  ;;  %v911_v60 = vmul.f32 %v903_v43, %v1514_v4 }
 0x1a7   :  { %v953_v48 = vsel %vm945_vm11, %v1503_v52, %v937_v45  ;;  %v1119_v58 = vpop.eup %1118  ;;  %v934_v3 = vmul.f32 %v1117_v57, %v910_v63 }
 0x1a8   :  { %1003 = vmatpush.msra.mxu2 %v953_v48  ;;  %1120 = vrcp.f32 %v919_v25  ;;  %v933_v39 = vmul.f32 %v1119_v58, %v909_v27 }
 0x1a9   :  { %1122 = vrcp.f32 %v916_v10  ;;  %v950_v1 = vsel %vm942_vm14, %v1509_v59, %v934_v3 }
 0x1aa   :  { %1004 = vmatpush.msra.mxu2 %v952_v50  ;;  %1124 = vrcp.f32 %v915_v49  ;;  %v949_v62 = vsel %vm941_vm15, %v1496_v40, %v933_v39  ;;  %v954_v40 = vld [vmem:[%s1561_s5] sm:$0xff] }
 0x1ab   :  { %1126 = vrcp.f32 %v914_v55 }
 0x1ae   :  { %v1121_v0 = vpop.eup %1120 }
 0x1af   :  { %v935_v52 = vmul.f32 %v1121_v0, %v911_v60  ;;  %v1123_v17 = vpop.eup %1122 }
 0x1b0   :  { %v1125_v6 = vpop.eup %1124  ;;  %v932_v9 = vmul.f32 %v1123_v17, %v908_v41 }
 0x1b1   :  { %v951_v54 = vsel %vm943_vm13, %v1514_v4, %v935_v52  ;;  %v1127_v32 = vpop.eup %1126  ;;  %v931_v11 = vmul.f32 %v1125_v6, %v907_v7  ;;  %v906_v4 = vmul.f32 %v898_v47, %v1505_v56 }
 0x1b2   :  { %1005 = vmatpush.msra.mxu2 %v951_v54  ;;  %v948_v12 = vsel %vm940_vm0, %v1498_v30, %v932_v9  ;;  %v955_v30 = vld [vmem:[%s1561_s5 + $0x8] sm:$0xff] }
 0x1b3   :  { %v930_v13 = vmul.f32 %v1127_v32, %v906_v4  ;;  %v947_v59 = vsel %vm939_vm1, %v1501_v51, %v931_v11  ;;  %v956_v51 = vld [vmem:[%s1561_s5 + $0x10] sm:$0xff]  ;;  %s1162_s5 = smov 128  }
 0x1b4   :  { %1006 = vmatpush.msra.mxu2 %v950_v1 }
 0x1b5   :  { %v946_v14 = vsel %vm938_vm2, %v1505_v56, %v930_v13 }
 0x1b6   :  { %1007 = vmatpush.msra.mxu2 %v949_v62 }
 0x1b8   :  { %1008 = vmatpush.msra.mxu2 %v948_v12 }
 0x1ba   :  { %1009 = vmatpush.msra.mxu2 %v947_v59 }
 0x1bc   :  { %1010 = vmatpush.msra.mxu2 %v946_v14 }
 0x1bd   :  { %1074 = vmatmul.msk.f32.vlgmr.msra.gmra.mxu2 %vm982_vm3, %v954_v40 }
 0x1c5   :  { %1075 = vmatmul.msk.f32.gmra.mxu2 %vm982_vm3, %v955_v30 }
 0x1cd   :  { %1076 = vmatmul.msk.f32.gmra.mxu2 %vm982_vm3, %v956_v51 }
 0x1d5   :  { %1077 = vmatmul.msk.f32.gmra.mxu2 %vm982_vm3, %v957_v53 }
 0x240   :  { %v1012_v15 = vpop.f32.mrf.mxu2 }
 0x241   :  { %v1013_v56 = vadd.f32 %v1012_v15, %v965_v19 }
 0x243   :  { %1024 = vst [vmem:[#allocation2] sm:$0xff] %v1013_v56 }
 0x248   :  { %v1015_v16 = vpop.f32.mrf.mxu2 }
 0x249   :  { %v1016_v18 = vadd.f32 %v1015_v16, %v970_v2 }
 0x24b   :  { %1025 = vst [vmem:[#allocation2 + $0x8] sm:$0xff] %v1016_v18 }
 0x250   :  { %v1018_v21 = vpop.f32.mrf.mxu2 }
 0x251   :  { %v1019_v22 = vadd.f32 %v1018_v21, %v975_v20 }
 0x253   :  { %1026 = vst [vmem:[#allocation2 + $0x10] sm:$0xff] %v1019_v22 }
 0x258   :  { %v1021_v24 = vpop.f32.mrf.mxu2 }
 0x259   :  { %v1022_v28 = vadd.f32 %v1021_v24, %v980_v61 }
 0x25b   :  { %1027 = vst [vmem:[#allocation2 + $0x18] sm:$0xff] %v1022_v28 }
 0x25c   :  { %1040 = dma.vmem_to_hbm [thread:$0]  %s1033_s16, 512, %s1035_s19, [#allocation3], %s1162_s5, %s1162_s5, %s1163_s20  }
 0x25d   :  { %1152 = dma.done.wait [#allocation3], 512  }
 0x25e   :  { %1153 = vsyncadd [#allocation3], 4294966784 }
 0x25f   :  { %1045 = vsyncpa [#allocation3], 1 }

</bundles_post_ra>
